<compile_context>
chip_gen: v5e
topology: v5e:2x2
jax: 0.10.0
libtpu: 0.0.40
codegen_flags: <defaults>
</compile_context>

<pallas_src>
import functools

import jax
import jax.numpy as jnp
from jax.experimental import pallas as pl
from jax.experimental.pallas import tpu as pltpu

NUM_GROUPS = 32


def _detect_vmem_capacity():
    try:
        return int(pltpu.get_tpu_info().vmem_capacity_bytes)
    except Exception:
        return 64 * 1024 * 1024          # conservative (v7x-like) default


_VMEM_CAPACITY = _detect_vmem_capacity()
if _VMEM_CAPACITY >= 100 * 1024 * 1024:   # v5e / v6e: 128 MiB per core
    VMEM_LIMIT = 96 * 1024 * 1024
    TM_CAP, TN_CAP = 512, 1024
else:                                     # v7x: 64 MiB per TensorCore
    VMEM_LIMIT = 48 * 1024 * 1024
    TM_CAP, TN_CAP = 256, 512


def _round_up(x, m):
    return ((x + m - 1) // m) * m


def _pick_tile(dim, max_tile, align):
    """Largest multiple of `align` that is <= max_tile and divides dim."""
    t = (min(max_tile, dim) // align) * align
    while t > align and dim % t != 0:
        t -= align
    return max(t, align)


# ------------------------------ MXU matmul ------------------------------
# K always fits VMEM for this model, so there is no K grid axis: each
# (tm, tn) output tile is a single MXU stream (no scratch, no pl.when).

def _mm_kernel(a_ref, b_ref, o_ref):
    o_ref[...] = jnp.dot(a_ref[...], b_ref[...],
                         preferred_element_type=jnp.float32).astype(o_ref.dtype)


def _mm_res_kernel(a_ref, b_ref, r_ref, o_ref):
    acc = jnp.dot(a_ref[...], b_ref[...], preferred_element_type=jnp.float32)
    o_ref[...] = (acc + r_ref[...].astype(jnp.float32)).astype(o_ref.dtype)


def pallas_matmul(a, b, residual=None, out_dtype=jnp.bfloat16):
    """bf16 (M,K) @ bf16 (K,N) [+ bf16 residual (M,N)] -> out_dtype (M,N)."""
    M, K = a.shape
    K2, N = b.shape
    assert K == K2
    has_res = residual is not None

    M_pad = _round_up(M, 16)            # bf16 packs two rows per sublane
    if M_pad != M:
        a = jnp.pad(a, ((0, M_pad - M), (0, 0)))
        if has_res:
            residual = jnp.pad(residual, ((0, M_pad - M), (0, 0)))

    tn = N if N <= TN_CAP else _pick_tile(N, TN_CAP, 128)
    tm = _pick_tile(M_pad, TM_CAP, 16)

    # keep the (double-buffered) per-step working set well inside the budget
    def _ws(tm_, tn_):
        return 4 * (tm_ * K + K * tn_) + 4 * tm_ * tn_ * (2 if has_res else 1)

    budget = int(VMEM_LIMIT * 0.6)
    while _ws(tm, tn) > budget and tm > 16:
        tm = _pick_tile(M_pad, max(16, tm // 2), 16)
    while _ws(tm, tn) > budget and tn > 128 and N % 128 == 0:
        tn = _pick_tile(N, max(128, tn // 2), 128)

    grid = (M_pad // tm, N // tn)
    a_spec = pl.BlockSpec((tm, K), lambda i, j: (i, 0))
    b_spec = pl.BlockSpec((K, tn), lambda i, j: (0, j))
    o_spec = pl.BlockSpec((tm, tn), lambda i, j: (i, j))
    cp = pltpu.CompilerParams(dimension_semantics=("parallel", "parallel"),
                              vmem_limit_bytes=VMEM_LIMIT)
    flops = 2 * M_pad * N * K
    bytes_accessed = (M_pad * K + K * N + M_pad * N * (2 if has_res else 1)) * 2
    cost = pl.CostEstimate(flops=flops, transcendentals=0,
                           bytes_accessed=bytes_accessed)

    if has_res:
        out = pl.pallas_call(
            _mm_res_kernel,
            out_shape=jax.ShapeDtypeStruct((M_pad, N), out_dtype),
            grid_spec=pltpu.PrefetchScalarGridSpec(
                num_scalar_prefetch=0, grid=grid,
                in_specs=[a_spec, b_spec,
                          pl.BlockSpec((tm, tn), lambda i, j: (i, j))],
                out_specs=o_spec),
            compiler_params=cp, cost_estimate=cost,
        )(a, b, residual)
    else:
        out = pl.pallas_call(
            _mm_kernel,
            out_shape=jax.ShapeDtypeStruct((M_pad, N), out_dtype),
            grid_spec=pltpu.PrefetchScalarGridSpec(
                num_scalar_prefetch=0, grid=grid,
                in_specs=[a_spec, b_spec], out_specs=o_spec),
            compiler_params=cp, cost_estimate=cost,
        )(a, b)

    if M_pad != M:
        out = out[:M]
    return out


# ------------------------ weight standardization ------------------------

def _wstd_kernel(w_ref, o_ref):
    # Per output channel (column): biased mean/var over (cin, kh, kw), eps=1e-10.
    w = w_ref[...]
    m = jnp.mean(w, axis=0, keepdims=True)
    d = w - m
    v = jnp.mean(d * d, axis=0, keepdims=True)
    o_ref[...] = (d * jax.lax.rsqrt(v + 1e-10)).astype(o_ref.dtype)


def standardize_weight(w_oihw):
    """OIHW f32 -> standardized bf16 (K, cout), K ordered (kh, kw, cin)."""
    cout, cin, kh, kw = w_oihw.shape
    K = kh * kw * cin
    w_kc = jnp.transpose(w_oihw, (2, 3, 1, 0)).reshape(K, cout)
    if cout % 256 == 0:
        tc = 256
    elif cout % 128 == 0:
        tc = 128
    else:
        tc = cout
    return pl.pallas_call(
        _wstd_kernel,
        out_shape=jax.ShapeDtypeStruct((K, cout), jnp.bfloat16),
        grid_spec=pltpu.PrefetchScalarGridSpec(
            num_scalar_prefetch=0, grid=(cout // tc,),
            in_specs=[pl.BlockSpec((K, tc), lambda j: (0, j))],
            out_specs=pl.BlockSpec((K, tc), lambda j: (0, j))),
        compiler_params=pltpu.CompilerParams(
            dimension_semantics=("parallel",), vmem_limit_bytes=VMEM_LIMIT),
    )(w_kc)


# --------------------------- GroupNorm + ReLU ---------------------------

def _gn_relu_kernel(x_ref, g_ref, b_ref, o_ref, *, groups_per_tile):
    x = x_ref[0].astype(jnp.float32)                 # (HW, TC)
    HW, TC = x.shape
    cg = TC // groups_per_tile
    inv_count = 1.0 / (cg * HW)

    # group-membership one-hot built in-registers (no HBM traffic)
    onehot = (jax.lax.broadcasted_iota(jnp.int32, (groups_per_tile, TC), 1) // cg ==
              jax.lax.broadcasted_iota(jnp.int32, (groups_per_tile, TC), 0)
              ).astype(jnp.float32)                  # (G, TC)

    ch_sum = jnp.sum(x, axis=0, keepdims=True)                              # (1, TC)
    grp_mean = jnp.sum(onehot * ch_sum, axis=1, keepdims=True) * inv_count  # (G, 1)
    mean_c = jnp.sum(onehot * grp_mean, axis=0, keepdims=True)              # (1, TC)

    d = x - mean_c
    ch_sq = jnp.sum(d * d, axis=0, keepdims=True)                           # (1, TC)
    grp_var = jnp.sum(onehot * ch_sq, axis=1, keepdims=True) * inv_count    # (G, 1)
    inv_std_c = jnp.sum(onehot * jax.lax.rsqrt(grp_var + 1e-5),
                        axis=0, keepdims=True)                              # (1, TC)

    y = jnp.maximum(d * (g_ref[...] * inv_std_c) + b_ref[...], 0.0)
    o_ref[0] = y.astype(o_ref.dtype)


def group_norm_relu(x, gamma, beta, num_groups=NUM_GROUPS):
    """x: (N,H,W,C) bf16 -> (N,H,W,C) bf16; GroupNorm(num_groups)+affine+ReLU."""
    N, H, W, C = x.shape
    HW = H * W
    cg = C // num_groups
    tc = 128 if C % 128 == 0 else C      # channel tile; groups never straddle it
    assert tc % cg == 0
    gpt = tc // cg
    xr = x.reshape(N, HW, C)
    g = gamma.reshape(1, C).astype(jnp.float32)
    b = beta.reshape(1, C).astype(jnp.float32)
    kern = functools.partial(_gn_relu_kernel, groups_per_tile=gpt)
    y = pl.pallas_call(
        kern,
        out_shape=jax.ShapeDtypeStruct((N, HW, C), jnp.bfloat16),
        grid_spec=pltpu.PrefetchScalarGridSpec(
            num_scalar_prefetch=0, grid=(N, C // tc),
            in_specs=[pl.BlockSpec((1, HW, tc), lambda n, c: (n, 0, c)),
                      pl.BlockSpec((1, tc), lambda n, c: (0, c)),
                      pl.BlockSpec((1, tc), lambda n, c: (0, c))],
            out_specs=pl.BlockSpec((1, HW, tc), lambda n, c: (n, 0, c))),
        compiler_params=pltpu.CompilerParams(
            dimension_semantics=("parallel", "parallel"),
            vmem_limit_bytes=VMEM_LIMIT),
    )(xr, g, b)
    return y.reshape(N, H, W, C)


# ------------------------------- max pool -------------------------------
# ConstantPad2d(1,0) + MaxPool2d(3, stride=2).  The padded input is parity-
# reshaped (a free metadata reshape) so every one of the 9 taps is a
# contiguous slice; the 9-way max happens entirely in VMEM.

def _maxpool_kernel(x_ref, o_ref, *, Po, Qo, C):
    m = None
    for dy in range(3):
        rp, ro = dy % 2, dy // 2
        for dx in range(3):
            cp, co = dx % 2, dx // 2
            t = x_ref[0, ro:ro + Po, rp, co:co + Qo, cp * C:(cp + 1) * C]
            m = t if m is None else jnp.maximum(m, t)
    o_ref[0] = m.astype(o_ref.dtype)


def max_pool_3x3_s2_p1(x):
    N, H, W, C = x.shape
    xp = jnp.pad(x, ((0, 0), (1, 1), (1, 1), (0, 0)))
    Hp, Wp = H + 2, W + 2
    Po = (Hp - 3) // 2 + 1
    Qo = (Wp - 3) // 2 + 1
    ph, pw = Hp % 2, Wp % 2
    if ph or pw:
        # evenness filler rows/cols are never read (window extent uses Hp/Wp)
        xp = jnp.pad(xp, ((0, 0), (0, ph), (0, pw), (0, 0)))
    Hp2, Wp2 = (Hp + ph) // 2, (Wp + pw) // 2
    x5 = xp.reshape(N, Hp2, 2, Wp2, 2 * C)     # free parity reshape
    kern = functools.partial(_maxpool_kernel, Po=Po, Qo=Qo, C=C)
    return pl.pallas_call(
        kern,
        out_shape=jax.ShapeDtypeStruct((N, Po, Qo, C), x.dtype),
        grid_spec=pltpu.PrefetchScalarGridSpec(
            num_scalar_prefetch=0, grid=(N,),
            in_specs=[pl.BlockSpec((1, Hp2, 2, Wp2, 2 * C),
                                   lambda n: (n, 0, 0, 0, 0))],
            out_specs=pl.BlockSpec((1, Po, Qo, C), lambda n: (n, 0, 0, 0))),
        compiler_params=pltpu.CompilerParams(
            dimension_semantics=("parallel",), vmem_limit_bytes=VMEM_LIMIT),
    )(x5)


# ----------------------- fused 3x3 convolutions --------------------------
# Per grid step (one image) the padded activation block lives in VMEM and the
# nine (dy, dx) taps are accumulated as shifted 1x1 matmuls in f32 registers.

def _conv3x3_s1_kernel(x_ref, w_ref, o_ref, *, Ho, Wo):
    acc = None
    for dy in range(3):
        for dx in range(3):
            a = x_ref[0, dy:dy + Ho, dx:dx + Wo, :]          # (Ho, Wo, C)
            a2 = a.reshape(Ho * Wo, a.shape[-1])
            p = jnp.dot(a2, w_ref[dy * 3 + dx],
                        preferred_element_type=jnp.float32)
            acc = p if acc is None else acc + p
    o_ref[0] = acc.astype(o_ref.dtype)


def _conv3x3_s2_kernel(x_ref, w_ref, o_ref, *, Ho, Wo, C):
    acc = None
    for dy in range(3):
        rp, ro = dy % 2, dy // 2
        for dx in range(3):
            cp, co = dx % 2, dx // 2
            a = x_ref[0, ro:ro + Ho, rp, co:co + Wo, cp * C:(cp + 1) * C]
            a2 = a.reshape(Ho * Wo, C)
            p = jnp.dot(a2, w_ref[dy * 3 + dx],
                        preferred_element_type=jnp.float32)
            acc = p if acc is None else acc + p
    o_ref[0] = acc.astype(o_ref.dtype)


def conv3x3_stride1(x, w9):
    """x: (N,H,W,C) bf16, w9: (9,C,Co) bf16 -> (N,H,W,Co) bf16 (pad=1, s=1)."""
    N, H, W, C = x.shape
    Co = w9.shape[-1]
    xp = jnp.pad(x, ((0, 0), (1, 1), (1, 1), (0, 0)))
    Hp, Wp = H + 2, W + 2
    kern = functools.partial(_conv3x3_s1_kernel, Ho=H, Wo=W)
    out = pl.pallas_call(
        kern,
        out_shape=jax.ShapeDtypeStruct((N, H * W, Co), jnp.bfloat16),
        grid_spec=pltpu.PrefetchScalarGridSpec(
            num_scalar_prefetch=0, grid=(N,),
            in_specs=[pl.BlockSpec((1, Hp, Wp, C), lambda n: (n, 0, 0, 0)),
                      pl.BlockSpec((9, C, Co), lambda n: (0, 0, 0))],
            out_specs=pl.BlockSpec((1, H * W, Co), lambda n: (n, 0, 0))),
        compiler_params=pltpu.CompilerParams(
            dimension_semantics=("parallel",), vmem_limit_bytes=VMEM_LIMIT),
    )(xp, w9)
    return out.reshape(N, H, W, Co)


def conv3x3_stride2(x, w9):
    """x: (N,H,W,C) bf16, w9: (9,C,Co) bf16 -> (N,Ho,Wo,Co) bf16 (pad=1, s=2)."""
    N, H, W, C = x.shape
    Co = w9.shape[-1]
    Ho = (H - 1) // 2 + 1
    Wo = (W - 1) // 2 + 1
    xp = jnp.pad(x, ((0, 0), (1, 1), (1, 1), (0, 0)))
    Hp, Wp = H + 2, W + 2
    ph, pw = Hp % 2, Wp % 2
    if ph or pw:
        xp = jnp.pad(xp, ((0, 0), (0, ph), (0, pw), (0, 0)))
    Hp2, Wp2 = (Hp + ph) // 2, (Wp + pw) // 2
    x5 = xp.reshape(N, Hp2, 2, Wp2, 2 * C)       # free parity reshape
    kern = functools.partial(_conv3x3_s2_kernel, Ho=Ho, Wo=Wo, C=C)
    out = pl.pallas_call(
        kern,
        out_shape=jax.ShapeDtypeStruct((N, Ho * Wo, Co), jnp.bfloat16),
        grid_spec=pltpu.PrefetchScalarGridSpec(
            num_scalar_prefetch=0, grid=(N,),
            in_specs=[pl.BlockSpec((1, Hp2, 2, Wp2, 2 * C),
                                   lambda n: (n, 0, 0, 0, 0)),
                      pl.BlockSpec((9, C, Co), lambda n: (0, 0, 0))],
            out_specs=pl.BlockSpec((1, Ho * Wo, Co), lambda n: (n, 0, 0))),
        compiler_params=pltpu.CompilerParams(
            dimension_semantics=("parallel",), vmem_limit_bytes=VMEM_LIMIT),
    )(x5, w9)
    return out.reshape(N, Ho, Wo, Co)


# ---------------------------- conv dispatch -----------------------------

def _im2col_nhwc(x, kh, kw, stride, pad):
    if pad:
        x = jnp.pad(x, ((0, 0), (pad, pad), (pad, pad), (0, 0)))
    N, H, W, C = x.shape
    Ho = (H - kh) // stride + 1
    Wo = (W - kw) // stride + 1
    cols = []
    for i in range(kh):
        for j in range(kw):
            cols.append(x[:, i:i + stride * (Ho - 1) + 1:stride,
                          j:j + stride * (Wo - 1) + 1:stride, :])
    patches = jnp.concatenate(cols, axis=-1)          # (N, Ho, Wo, kh*kw*C)
    return patches.reshape(N * Ho * Wo, kh * kw * C), Ho, Wo


def conv_apply(x, conv, residual=None):
    """x: (N,H,W,Cin) bf16; conv dict holds standardized bf16 weights + meta."""
    kind = conv['kind']
    s = conv['stride']
    N, H, W, C = x.shape
    if kind == '1x1':
        if s != 1:
            # TODO(synk): fold the stride-2 pixel selection into the matmul's
            # A index_map instead of materializing the strided slice.
            x = x[:, ::s, ::s, :]
            N, H, W, C = x.shape
        a = x.reshape(N * H * W, C)
        res = None if residual is None else residual.reshape(N * H * W, -1)
        out = pallas_matmul(a, conv['w'], residual=res)
        return out.reshape(N, H, W, -1)
    if kind == '3x3' and s == 1:
        assert residual is None
        return conv3x3_stride1(x, conv['w9'])
    if kind == '3x3' and s == 2:
        assert residual is None
        return conv3x3_stride2(x, conv['w9'])
    # generic fallback (7x7 root conv)
    patches, Ho, Wo = _im2col_nhwc(x, conv['kh'], conv['kw'], s, conv['pad'])
    res = None if residual is None else residual.reshape(N * Ho * Wo, -1)
    out = pallas_matmul(patches, conv['w'], residual=res)
    return out.reshape(N, Ho, Wo, -1)


# ----------------------------- model definition -----------------------------

def preact_bottleneck(x, p):
    out = group_norm_relu(x, p['gn1_g'], p['gn1_b'])        # bf16, NHWC
    if 'downsample' in p:
        residual = conv_apply(out, p['downsample'])         # bf16, NHWC
    else:
        residual = x
    o = conv_apply(out, p['conv1'])
    o = group_norm_relu(o, p['gn2_g'], p['gn2_b'])
    o = conv_apply(o, p['conv2'])                           # fused 3x3
    o = group_norm_relu(o, p['gn3_g'], p['gn3_b'])
    # conv3 matmul fused with the residual add inside the Pallas kernel.
    return conv_apply(o, p['conv3'], residual=residual)


def _conv_init(key, shape, scale=0.05):
    return scale * jax.random.normal(key, shape, dtype=jnp.float32)


def _init_bottleneck(key, cin, cout, cmid, stride):
    ks = jax.random.split(key, 10)
    p = {
        'gn1_g': 1.0 + 0.1 * jax.random.normal(ks[0], (cin,), jnp.float32),
        'gn1_b': 0.1 * jax.random.normal(ks[1], (cin,), jnp.float32),
        'conv1': _conv_init(ks[2], (cmid, cin, 1, 1)),
        'gn2_g': 1.0 + 0.1 * jax.random.normal(ks[3], (cmid,), jnp.float32),
        'gn2_b': 0.1 * jax.random.normal(ks[4], (cmid,), jnp.float32),
        'conv2': _conv_init(ks[5], (cmid, cmid, 3, 3)),
        'gn3_g': 1.0 + 0.1 * jax.random.normal(ks[6], (cmid,), jnp.float32),
        'gn3_b': 0.1 * jax.random.normal(ks[7], (cmid,), jnp.float32),
        'conv3': _conv_init(ks[8], (cout, cmid, 1, 1)),
        'stride': stride,
    }
    if stride != 1 or cin != cout:
        p['downsample'] = _conv_init(ks[9], (cout, cin, 1, 1))
    return p


def init_resnetv2(key, last_stride, block_units, wf):
    k_root, k_body = jax.random.split(key)
    params = {'root_conv': _conv_init(k_root, (64 * wf, 3, 7, 7))}
    block_cfg = [
        (64 * wf, 256 * wf, 64 * wf, 1),
        (256 * wf, 512 * wf, 128 * wf, 2),
        (512 * wf, 1024 * wf, 256 * wf, 2),
        (1024 * wf, 2048 * wf, 512 * wf, last_stride),
    ]
    blocks = []
    keys = jax.random.split(k_body, 4)
    for bi, (cin, cout, cmid, stride) in enumerate(block_cfg):
        ukeys = jax.random.split(keys[bi], block_units[bi])
        units = []
        for ui in range(block_units[bi]):
            if ui == 0:
                units.append(_init_bottleneck(ukeys[ui], cin, cout, cmid, stride))
            else:
                units.append(_init_bottleneck(ukeys[ui], cout, cout, cmid, 1))
        blocks.append(units)
    params['blocks'] = blocks
    return params


def _prep_conv(w_oihw, stride, pad):
    cout, cin, kh, kw = w_oihw.shape
    w_std = standardize_weight(w_oihw)          # (kh*kw*cin, cout) bf16
    conv = {'stride': stride, 'pad': pad, 'kh': kh, 'kw': kw}
    if kh == 1 and kw == 1:
        conv['kind'] = '1x1'
        conv['w'] = w_std
    elif kh == 3 and kw == 3 and stride in (1, 2):
        conv['kind'] = '3x3'
        conv['w9'] = w_std.reshape(9, cin, cout)  # free reshape, (kh,kw,cin) order
    else:
        conv['kind'] = 'im2col'
        conv['w'] = w_std
    return conv


def prepare_params(raw):
    """Hoist weight standardization (and layout prep) out of the forward."""
    prepared = {'root_conv': _prep_conv(raw['root_conv'], 2, 3), 'blocks': []}
    for units in raw['blocks']:
        prep_units = []
        for p in units:
            stride = p['stride']
            q = {
                'gn1_g': p['gn1_g'], 'gn1_b': p['gn1_b'],
                'gn2_g': p['gn2_g'], 'gn2_b': p['gn2_b'],
                'gn3_g': p['gn3_g'], 'gn3_b': p['gn3_b'],
                'conv1': _prep_conv(p['conv1'], 1, 0),
                'conv2': _prep_conv(p['conv2'], stride, 1),
                'conv3': _prep_conv(p['conv3'], 1, 0),
            }
            if 'downsample' in p:
                q['downsample'] = _prep_conv(p['downsample'], stride, 0)
            prep_units.append(q)
        prepared['blocks'].append(prep_units)
    return prepared


def resnetv2_forward(prepared, x_nchw):
    # One NCHW->NHWC transpose at the start, one NHWC->NCHW at the very end;
    # everything in between stays pixel-major bf16.
    x = jnp.transpose(x_nchw, (0, 2, 3, 1)).astype(jnp.bfloat16)
    x = conv_apply(x, prepared['root_conv'])      # StdConv2d(3, 64wf, 7, s2, p3)
    x = max_pool_3x3_s2_p1(x)                     # ConstantPad2d(1,0)+MaxPool2d(3,s2)
    for units in prepared['blocks']:
        for p in units:
            x = preact_bottleneck(x, p)
    return jnp.transpose(x, (0, 3, 1, 2)).astype(jnp.float32)   # back to NCHW f32


# ----------------------------------- main -----------------------------------

if __name__ == "__main__":
    key = jax.random.PRNGKey(0)
    k_params, k_x = jax.random.split(key)

    last_stride = 1
    block_units = [1, 1, 1, 1]   # one PreActBottleneck per stage (small config)
    width_factor = 1             # GroupNorm(32, ...) needs channels >= 32

    raw_params = init_resnetv2(k_params, last_stride, block_units, width_factor)
    prepared = prepare_params(raw_params)   # weight standardization hoisted here

    x = jax.random.normal(k_x, (2, 3, 16, 16), dtype=jnp.float32)  # NCHW input

    fwd = jax.jit(lambda inp: resnetv2_forward(prepared, inp))
    out = jax.block_until_ready(fwd(x))

    assert out.shape == (2, 2048 * width_factor, 1, 1), out.shape
    assert bool(jnp.all(jnp.isfinite(out)))
    print("KERNEL_OK")
</pallas_src>

<mosaic_0001>
module attributes {stable_mosaic.version = 11 : i64} {
  func.func @_wstd_kernel(%arg0: i32, %arg1: memref<147x64xf32, #tpu.memory_space<vmem>>, %arg2: memref<147x64xbf16, #tpu.memory_space<vmem>>) attributes {dimension_semantics = [#tpu.dimension_semantics<parallel>], iteration_bounds = array<i64: 1>, scalar_prefetch = 0 : i64, scratch_operands = 0 : i64, tpu.core_type = #tpu.core_type<tc>, window_params = [{transform_indices = @transform_0, window_bounds = array<i64: 147, 64>}, {transform_indices = @transform_1, window_bounds = array<i64: 147, 64>}]} {
    %c0 = arith.constant 0 : index
    %c0_0 = arith.constant 0 : index
    %0 = vector.load %arg1[%c0, %c0_0] : memref<147x64xf32, #tpu.memory_space<vmem>>, vector<147x64xf32>
    %cst = arith.constant dense<0.000000e+00> : vector<64xf32>
    %1 = vector.multi_reduction <add>, %0, %cst [0] : vector<147x64xf32> to vector<64xf32>
    %2 = vector.shape_cast %1 : vector<64xf32> to vector<1x64xf32>
    %cst_1 = arith.constant 1.470000e+02 : f32
    %3 = vector.broadcast %cst_1 : f32 to vector<1x64xf32>
    %4 = arith.divf %2, %3 : vector<1x64xf32>
    %5 = vector.broadcast %4 : vector<1x64xf32> to vector<147x64xf32>
    %6 = arith.subf %0, %5 : vector<147x64xf32>
    %7 = arith.mulf %6, %6 : vector<147x64xf32>
    %cst_2 = arith.constant dense<0.000000e+00> : vector<64xf32>
    %8 = vector.multi_reduction <add>, %7, %cst_2 [0] : vector<147x64xf32> to vector<64xf32>
    %9 = vector.shape_cast %8 : vector<64xf32> to vector<1x64xf32>
    %cst_3 = arith.constant 1.470000e+02 : f32
    %10 = vector.broadcast %cst_3 : f32 to vector<1x64xf32>
    %11 = arith.divf %9, %10 : vector<1x64xf32>
    %cst_4 = arith.constant 1.000000e-10 : f32
    %12 = vector.broadcast %cst_4 : f32 to vector<1x64xf32>
    %13 = arith.addf %11, %12 : vector<1x64xf32>
    %14 = math.rsqrt %13 : vector<1x64xf32>
    %15 = vector.broadcast %14 : vector<1x64xf32> to vector<147x64xf32>
    %16 = arith.mulf %6, %15 : vector<147x64xf32>
    %17 = arith.truncf %16 : vector<147x64xf32> to vector<147x64xbf16>
    %c0_5 = arith.constant 0 : index
    %c0_6 = arith.constant 0 : index
    %18 = vector.load %arg2[%c0_5, %c0_6] : memref<147x64xbf16, #tpu.memory_space<vmem>>, vector<147x64xbf16>
    tpu.vector_store %arg2[%c0_5, %c0_6], %17 {strides = array<i32>} : memref<147x64xbf16, #tpu.memory_space<vmem>>, vector<147x64xbf16>,
    return
  }
  func.func @transform_0(%arg0: i32) -> (i32, i32) {
    %c0_i32 = arith.constant 0 : i32
    %c0_i32_0 = arith.constant 0 : i32
    return %c0_i32, %arg0 : i32, i32
  }
  func.func @transform_1(%arg0: i32) -> (i32, i32) {
    %c0_i32 = arith.constant 0 : i32
    %c0_i32_0 = arith.constant 0 : i32
    return %c0_i32, %arg0 : i32, i32
  }
}

</mosaic_0001>

<bundles_post_ra>
// kernel: tpu_custom_call.1
= control target key start
LH: loop header
LB: loop body
LE: loop exit
PB: predicated region body
PF: predicated region fallthrough
CT: control target
= control target key end

     0   :  { %vm27_vm0 = vcmask 523264   ;;  %v245_v39 = vmov 147.0   ;;  %vm63_vm1 = vcmask 518144   ;;  %vm211_vm6 = vcmask 519168   ;;  %s604_s0 = inlined_call_operand.vmem [shape: f32[147,64], index: 0, kind: input, shape index: {}]   ;;  %s605_s1 = inlined_call_operand.vmem [shape: bf16[147,64], index: 1, kind: output, shape index: {}]  }
   0x1   :  { %v259_v0 = vld [vmem:[%s604_s0] sm:$0xff]  ;;  %v264_v1 = vld [vmem:[%s604_s0 + $0x8] sm:$0xff]  ;;  %v269_v2 = vld [vmem:[%s604_s0 + $0x10] sm:$0xff]  ;;  %241 = vrcp.f32 %v245_v39  ;;  %vm230_vm7 = vcmask 517120   ;;  %vm231_vm8 = vsmask.f32 1280 }
   0x2   :  { %v274_v3 = vld [vmem:[%s604_s0 + $0x18] sm:$0xff]  ;;  %v28_v4 = vsel %vm27_vm0, %v259_v0, 0.0  ;;  %v29_v5 = vsel %vm27_vm0, %v264_v1, 0.0  ;;  %v31_v6 = vsel %vm27_vm0, %v269_v2, 0.0  ;;  %v285_v7 = vld [vmem:[%s604_s0 + $0x20] sm:$0xff]  ;;  %v292_v10 = vld [vmem:[%s604_s0 + $0x28] sm:$0xff] }
   0x3   :  { %v30_v8 = vadd.f32 %v29_v5, %v28_v4  ;;  %v33_v9 = vsel %vm27_vm0, %v274_v3, 0.0  ;;  %v35_v12 = vsel %vm27_vm0, %v285_v7, 0.0  ;;  %v299_v13 = vld [vmem:[%s604_s0 + $0x30] sm:$0xff]  ;;  %v37_v15 = vsel %vm27_vm0, %v292_v10, 0.0  ;;  %v306_v16 = vld [vmem:[%s604_s0 + $0x38] sm:$0xff]  ;;  %v313_v19 = vld [vmem:[%s604_s0 + $0x40] sm:$0xff] }
   0x4   :  { %v39_v18 = vsel %vm27_vm0, %v299_v13, 0.0  ;;  %v41_v21 = vsel %vm27_vm0, %v306_v16, 0.0  ;;  %v320_v22 = vld [vmem:[%s604_s0 + $0x48] sm:$0xff]  ;;  %v43_v24 = vsel %vm27_vm0, %v313_v19, 0.0  ;;  %v327_v25 = vld [vmem:[%s604_s0 + $0x50] sm:$0xff]  ;;  %v334_v28 = vld [vmem:[%s604_s0 + $0x58] sm:$0xff] }
   0x5   :  { %v32_v11 = vadd.f32 %v31_v6, %v30_v8  ;;  %v45_v27 = vsel %vm27_vm0, %v320_v22, 0.0  ;;  %v47_v30 = vsel %vm27_vm0, %v327_v25, 0.0  ;;  %v341_v31 = vld [vmem:[%s604_s0 + $0x60] sm:$0xff]  ;;  %v49_v33 = vsel %vm27_vm0, %v334_v28, 0.0  ;;  %v348_v34 = vld [vmem:[%s604_s0 + $0x68] sm:$0xff]  ;;  %v355_v37 = vld [vmem:[%s604_s0 + $0x70] sm:$0xff] }
   0x6   :  { %v51_v36 = vsel %vm27_vm0, %v341_v31, 0.0  ;;  %v53_v40 = vsel %vm27_vm0, %v348_v34, 0.0  ;;  %v362_v41 = vld [vmem:[%s604_s0 + $0x78] sm:$0xff]  ;;  %v55_v43 = vsel %vm27_vm0, %v355_v37, 0.0  ;;  %v369_v44 = vld [vmem:[%s604_s0 + $0x80] sm:$0xff]  ;;  %v376_v48 = vld [vmem:[%s604_s0 + $0x88] sm:$0xff] }
   0x7   :  { %v34_v14 = vadd.f32 %v33_v9, %v32_v11  ;;  %v57_v46 = vsel %vm27_vm0, %v362_v41, 0.0  ;;  %v242_v47 = vpop.eup %241  ;;  %v59_v50 = vsel %vm27_vm0, %v369_v44, 0.0  ;;  %v383_v51 = vld [vmem:[%s604_s0 + $0x90] sm:$0x7]  ;;  %v61_v53 = vsel %vm27_vm0, %v376_v48, 0.0  ;;  %vm232_vm9 = vmand %vm230_vm7, %vm231_vm8 }
   0x8   :  { %v73_v54 = vmul.f32 147.0, %v242_v47  ;;  %v64_v56 = vsel %vm63_vm1, %v383_v51, 0.0  ;;  %vm77_vm2 = vweird.f32 %v242_v47 }
   0x9   :  { %v36_v17 = vadd.f32 %v35_v12, %v34_v14 }
   0xa   :  { %v74_v58 = vsub.f32 1.0, %v73_v54 }
   0xb   :  { %v38_v20 = vadd.f32 %v37_v15, %v36_v17 }
   0xc   :  { %v75_v61 = vmul.f32 %v242_v47, %v74_v58 }
   0xd   :  { %v40_v23 = vadd.f32 %v39_v18, %v38_v20 }
   0xe   :  { %v76_v4 = vadd.f32 %v242_v47, %v75_v61 }
   0xf   :  { %v42_v26 = vadd.f32 %v41_v21, %v40_v23 }
  0x10   :  { %v389_v8 = vsel %vm77_vm2, %v242_v47, %v76_v4 }
  0x11   :  { %v44_v29 = vadd.f32 %v43_v24, %v42_v26 }
  0x13   :  { %v46_v32 = vadd.f32 %v45_v27, %v44_v29 }
  0x15   :  { %v48_v35 = vadd.f32 %v47_v30, %v46_v32 }
  0x17   :  { %v50_v38 = vadd.f32 %v49_v33, %v48_v35 }
  0x19   :  { %v52_v42 = vadd.f32 %v51_v36, %v50_v38 }
  0x1b   :  { %v54_v45 = vadd.f32 %v53_v40, %v52_v42 }
  0x1d   :  { %v56_v49 = vadd.f32 %v55_v43, %v54_v45 }
  0x1f   :  { %v58_v52 = vadd.f32 %v57_v46, %v56_v49 }
  0x21   :  { %v60_v55 = vadd.f32 %v59_v50, %v58_v52 }
  0x23   :  { %v62_v57 = vadd.f32 %v61_v53, %v60_v55 }
  0x25   :  { %v65_v59 = vadd.f32 %v64_v56, %v62_v57 }
  0x27   :  { %v66_v60 = vrot.slane %v65_v59, 4 }
  0x29   :  { %v67_v62 = vadd.f32 %v66_v60, %v65_v59 }
  0x2b   :  { %v68_v63 = vrot.slane %v67_v62, 2 }
  0x2d   :  { %v69_v5 = vadd.f32 %v68_v63, %v67_v62 }
  0x2f   :  { %v70_v6 = vrot.slane %v69_v5, 1 }
  0x31   :  { %v71_v9 = vadd.f32 %v70_v6, %v69_v5 }
  0x33   :  { %v79_v11 = vmul.f32 %v389_v8, %v71_v9 }
  0x35   :  { %v393_v12 = vsub.f32 %v259_v0, %v79_v11  ;;  %v396_v14 = vsub.f32 %v264_v1, %v79_v11  ;;  %v399_v15 = vsub.f32 %v269_v2, %v79_v11  ;;  %v402_v17 = vsub.f32 %v274_v3, %v79_v11 }
  0x36   :  { %v405_v18 = vsub.f32 %v285_v7, %v79_v11  ;;  %v414_v1 = vsub.f32 %v292_v10, %v79_v11  ;;  %v419_v3 = vsub.f32 %v299_v13, %v79_v11  ;;  %v427_v29 = vsub.f32 %v306_v16, %v79_v11 }
  0x37   :  { %v99_v20 = vmul.f32 %v393_v12, %v393_v12  ;;  %v100_v21 = vmul.f32 %v396_v14, %v396_v14  ;;  %v101_v0 = vmul.f32 %v399_v15, %v399_v15  ;;  %v102_v2 = vmul.f32 %v402_v17, %v402_v17 }
  0x38   :  { %v103_v7 = vmul.f32 %v405_v18, %v405_v18  ;;  %v104_v10 = vmul.f32 %v414_v1, %v414_v1  ;;  %v433_v32 = vsub.f32 %v313_v19, %v79_v11  ;;  %v105_v33 = vmul.f32 %v419_v3, %v419_v3 }
  0x39   :  { %v118_v23 = vsel %vm27_vm0, %v99_v20, 0.0  ;;  %v119_v24 = vsel %vm27_vm0, %v100_v21, 0.0  ;;  %v121_v27 = vsel %vm27_vm0, %v101_v0, 0.0  ;;  %v123_v30 = vsel %vm27_vm0, %v102_v2, 0.0 }
  0x3a   :  { %v120_v26 = vadd.f32 %v119_v24, %v118_v23  ;;  %v125_v35 = vsel %vm27_vm0, %v103_v7, 0.0  ;;  %v439_v38 = vsub.f32 %v320_v22, %v79_v11  ;;  %v106_v16 = vmul.f32 %v427_v29, %v427_v29 }
  0x3b   :  { %v127_v39 = vsel %vm27_vm0, %v104_v10, 0.0  ;;  %v445_v42 = vsub.f32 %v327_v25, %v79_v11  ;;  %v107_v19 = vmul.f32 %v433_v32, %v433_v32  ;;  %v129_v43 = vsel %vm27_vm0, %v105_v33, 0.0 }
  0x3c   :  { %v122_v13 = vadd.f32 %v121_v27, %v120_v26  ;;  %v451_v46 = vsub.f32 %v334_v28, %v79_v11  ;;  %v108_v22 = vmul.f32 %v439_v38, %v439_v38  ;;  %v131_v47 = vsel %vm27_vm0, %v106_v16, 0.0 }
  0x3d   :  { %v457_v50 = vsub.f32 %v341_v31, %v79_v11  ;;  %v109_v25 = vmul.f32 %v445_v42, %v445_v42  ;;  %v133_v52 = vsel %vm27_vm0, %v107_v19, 0.0  ;;  %v463_v54 = vsub.f32 %v348_v34, %v79_v11 }
  0x3e   :  { %v124_v36 = vadd.f32 %v123_v30, %v122_v13  ;;  %v110_v28 = vmul.f32 %v451_v46, %v451_v46  ;;  %v135_v55 = vsel %vm27_vm0, %v108_v22, 0.0  ;;  %v469_v57 = vsub.f32 %v355_v37, %v79_v11 }
  0x3f   :  { %v111_v31 = vmul.f32 %v457_v50, %v457_v50  ;;  %v137_v58 = vsel %vm27_vm0, %v109_v25, 0.0  ;;  %v475_v60 = vsub.f32 %v362_v41, %v79_v11  ;;  %v112_v34 = vmul.f32 %v463_v54, %v463_v54 }
  0x40   :  { %v126_v40 = vadd.f32 %v125_v35, %v124_v36  ;;  %v139_v61 = vsel %vm27_vm0, %v110_v28, 0.0  ;;  %v481_v63 = vsub.f32 %v369_v44, %v79_v11  ;;  %v113_v37 = vmul.f32 %v469_v57, %v469_v57 }
  0x41   :  { %v141_v4 = vsel %vm27_vm0, %v111_v31, 0.0  ;;  %v487_v6 = vsub.f32 %v376_v48, %v79_v11  ;;  %v114_v41 = vmul.f32 %v475_v60, %v475_v60  ;;  %v143_v9 = vsel %vm27_vm0, %v112_v34, 0.0 }
  0x42   :  { %v128_v45 = vadd.f32 %v127_v39, %v126_v40  ;;  %v493_v21 = vsub.f32 %v383_v51, %v79_v11  ;;  %v115_v44 = vmul.f32 %v481_v63, %v481_v63  ;;  %v145_v0 = vsel %vm27_vm0, %v113_v37, 0.0 }
  0x43   :  { %v116_v7 = vmul.f32 %v487_v6, %v487_v6  ;;  %v147_v48 = vsel %vm27_vm0, %v114_v41, 0.0 }
  0x44   :  { %v130_v49 = vadd.f32 %v129_v43, %v128_v45  ;;  %v117_v24 = vmul.f32 %v493_v21, %v493_v21  ;;  %v149_v26 = vsel %vm27_vm0, %v115_v44, 0.0 }
  0x45   :  { %v151_v51 = vsel %vm27_vm0, %v116_v7, 0.0 }
  0x46   :  { %v132_v53 = vadd.f32 %v131_v47, %v130_v49  ;;  %v153_v10 = vsel %vm63_vm1, %v117_v24, 0.0 }
  0x48   :  { %v134_v56 = vadd.f32 %v133_v52, %v132_v53 }
  0x4a   :  { %v136_v59 = vadd.f32 %v135_v55, %v134_v56 }
  0x4c   :  { %v138_v62 = vadd.f32 %v137_v58, %v136_v59 }
  0x4e   :  { %v140_v5 = vadd.f32 %v139_v61, %v138_v62 }
  0x50   :  { %v142_v20 = vadd.f32 %v141_v4, %v140_v5 }
  0x52   :  { %v144_v2 = vadd.f32 %v143_v9, %v142_v20 }
  0x54   :  { %v146_v23 = vadd.f32 %v145_v0, %v144_v2  ;;  %v233_v2 = vld [vmem:[%s605_s1 + $0x48] sm:$0x3] }
  0x56   :  { %v148_v27 = vadd.f32 %v147_v48, %v146_v23 }
  0x58   :  { %v150_v11 = vadd.f32 %v149_v26, %v148_v27 }
  0x5a   :  { %v152_v30 = vadd.f32 %v151_v51, %v150_v11 }
  0x5c   :  { %v154_v13 = vadd.f32 %v153_v10, %v152_v30 }
  0x5e   :  { %v155_v33 = vrot.slane %v154_v13, 4 }
  0x60   :  { %v156_v35 = vadd.f32 %v155_v33, %v154_v13 }
  0x62   :  { %v157_v36 = vrot.slane %v156_v35, 2 }
  0x64   :  { %v158_v16 = vadd.f32 %v157_v36, %v156_v35 }
  0x66   :  { %v159_v39 = vrot.slane %v158_v16, 1 }
  0x68   :  { %v160_v40 = vadd.f32 %v159_v39, %v158_v16 }
  0x6a   :  { %v161_v19 = vmul.f32 %v160_v40, %v389_v8 }
  0x6c   :  { %v162_v43 = vadd.f32 1e-10, %v161_v19 }
  0x6e   :  { %243 = vrsqrt.f32 %v162_v43  ;;  %vm169_vm3 = vweird.f32 %v162_v43 }
  0x74   :  { %v244_v45 = vpop.eup %243 }
  0x75   :  { %v164_v22 = vmul.f32 %v244_v45, %v162_v43  ;;  %vm170_vm4 = vweird.f32 %v244_v45 }
  0x76   :  { %vm171_vm5 = vmor %vm169_vm3, %vm170_vm4 }
  0x77   :  { %v165_v47 = vmul.f32 %v244_v45, %v164_v22 }
  0x79   :  { %v166_v49 = vmul.f32 0.5, %v165_v47 }
  0x7b   :  { %v167_v25 = vsub.f32 1.5, %v166_v49 }
  0x7d   :  { %v168_v52 = vmul.f32 %v244_v45, %v167_v25 }
  0x7f   :  { %v172_v53 = vsel %vm171_vm5, %v244_v45, %v168_v52 }
  0x80   :  { %v173_v28 = vmul.f32 %v172_v53, %v393_v12  ;;  %v174_v55 = vmul.f32 %v172_v53, %v396_v14  ;;  %v175_v56 = vmul.f32 %v172_v53, %v399_v15  ;;  %v176_v8 = vmul.f32 %v172_v53, %v402_v17 }
  0x81   :  { %v177_v31 = vmul.f32 %v172_v53, %v405_v18  ;;  %v178_v58 = vmul.f32 %v172_v53, %v414_v1  ;;  %v179_v62 = vmul.f32 %v172_v53, %v419_v3  ;;  %v180_v4 = vmul.f32 %v172_v53, %v427_v29 }
  0x82   :  { %v192_v59 = vpack.c.bf16 %v173_v28, %v173_v28  ;;  %v193_v34 = vpack.c.bf16 %v174_v55, %v174_v55  ;;  %v194_v61 = vpack.c.bf16 %v175_v56, %v175_v56  ;;  %v195_v37 = vpack.c.bf16 %v176_v8, %v176_v8 }
  0x83   :  { %v196_v12 = vpack.c.bf16 %v177_v31, %v177_v31  ;;  %v181_v14 = vmul.f32 %v172_v53, %v433_v32  ;;  %v197_v15 = vpack.c.bf16 %v178_v58, %v178_v58  ;;  %v182_v17 = vmul.f32 %v172_v53, %v439_v38 }
  0x84   :  { %212 = vst.msk [vmem:[%s605_s1] sm:$0xf] %vm211_vm6, %v192_v59  ;;  %v198_v18 = vpack.c.bf16 %v179_v62, %v179_v62  ;;  %v183_v1 = vmul.f32 %v172_v53, %v445_v42  ;;  %v199_v3 = vpack.c.bf16 %v180_v4, %v180_v4  ;;  %v184_v29 = vmul.f32 %v172_v53, %v451_v46 }
  0x85   :  { %213 = vst.msk [vmem:[%s605_s1 + $0x4] sm:$0xf] %vm211_vm6, %v193_v34  ;;  %v200_v32 = vpack.c.bf16 %v181_v14, %v181_v14  ;;  %v185_v38 = vmul.f32 %v172_v53, %v457_v50  ;;  %v201_v42 = vpack.c.bf16 %v182_v17, %v182_v17  ;;  %v186_v5 = vmul.f32 %v172_v53, %v463_v54 }
  0x86   :  { %214 = vst.msk [vmem:[%s605_s1 + $0x8] sm:$0xf] %vm211_vm6, %v194_v61  ;;  %v202_v46 = vpack.c.bf16 %v183_v1, %v183_v1  ;;  %v187_v41 = vmul.f32 %v172_v53, %v469_v57  ;;  %v203_v50 = vpack.c.bf16 %v184_v29, %v184_v29  ;;  %v188_v9 = vmul.f32 %v172_v53, %v475_v60 }
  0x87   :  { %215 = vst.msk [vmem:[%s605_s1 + $0xc] sm:$0xf] %vm211_vm6, %v195_v37  ;;  %v191_v20 = vmul.f32 %v172_v53, %v493_v21  ;;  %v204_v54 = vpack.c.bf16 %v185_v38, %v185_v38  ;;  %v189_v44 = vmul.f32 %v172_v53, %v481_v63  ;;  %v205_v57 = vpack.c.bf16 %v186_v5, %v186_v5 }
  0x88   :  { %216 = vst.msk [vmem:[%s605_s1 + $0x10] sm:$0xf] %vm211_vm6, %v196_v12  ;;  %v190_v0 = vmul.f32 %v172_v53, %v487_v6  ;;  %v206_v60 = vpack.c.bf16 %v187_v41, %v187_v41  ;;  %v207_v63 = vpack.c.bf16 %v188_v9, %v188_v9 }
  0x89   :  { %217 = vst.msk [vmem:[%s605_s1 + $0x14] sm:$0xf] %vm211_vm6, %v197_v15  ;;  %v210_v21 = vpack.c.bf16 %v191_v20, %v191_v20  ;;  %v208_v6 = vpack.c.bf16 %v189_v44, %v189_v44 }
  0x8a   :  { %218 = vst.msk [vmem:[%s605_s1 + $0x18] sm:$0xf] %vm211_vm6, %v198_v18  ;;  %v209_v7 = vpack.c.bf16 %v190_v0, %v190_v0 }
  0x8b   :  { %219 = vst.msk [vmem:[%s605_s1 + $0x1c] sm:$0xf] %vm211_vm6, %v199_v3  ;;  %v234_v48 = vsel %vm232_vm9, %v210_v21, %v233_v2 }
  0x8c   :  { %220 = vst.msk [vmem:[%s605_s1 + $0x20] sm:$0xf] %vm211_vm6, %v200_v32 }
  0x8d   :  { %221 = vst.msk [vmem:[%s605_s1 + $0x24] sm:$0xf] %vm211_vm6, %v201_v42 }
  0x8e   :  { %222 = vst.msk [vmem:[%s605_s1 + $0x28] sm:$0xf] %vm211_vm6, %v202_v46 }
  0x8f   :  { %223 = vst.msk [vmem:[%s605_s1 + $0x2c] sm:$0xf] %vm211_vm6, %v203_v50 }
  0x90   :  { %224 = vst.msk [vmem:[%s605_s1 + $0x30] sm:$0xf] %vm211_vm6, %v204_v54 }
  0x91   :  { %225 = vst.msk [vmem:[%s605_s1 + $0x34] sm:$0xf] %vm211_vm6, %v205_v57 }
  0x92   :  { %226 = vst.msk [vmem:[%s605_s1 + $0x38] sm:$0xf] %vm211_vm6, %v206_v60 }
  0x93   :  { %227 = vst.msk [vmem:[%s605_s1 + $0x3c] sm:$0xf] %vm211_vm6, %v207_v63 }
  0x94   :  { %228 = vst.msk [vmem:[%s605_s1 + $0x40] sm:$0xf] %vm211_vm6, %v208_v6 }
  0x95   :  { %229 = vst.msk [vmem:[%s605_s1 + $0x44] sm:$0xf] %vm211_vm6, %v209_v7 }
  0x96   :  { %235 = vst [vmem:[%s605_s1 + $0x48] sm:$0x3] %v234_v48 }

</bundles_post_ra>
